<compile_context>
chip_gen: v5e
topology: v5e:2x2
jax: 0.10.0
libtpu: 0.0.40
codegen_flags: <defaults>
</compile_context>

<pallas_src>
import jax
import jax.numpy as jnp
from jax.experimental import pallas as pl
from jax.experimental.pallas import tpu as pltpu

# Hyperparameters that come from argparse in the original script.
RALPHA = 0.2      # args.ralpha (LeakyReLU negative slope)
SCALEF = 2.0      # args.scalef (output scaling)
DROPOUT = 0.1     # args.dr     (identity in eval mode)
BN_EPS = 1e-5

# Decoder dims: decoder_dims = [args.third, args.second, args.first]
THIRD = 32         # latent / decoder input dim
SECOND = 64
SECOND_PAD = 128   # SECOND zero-padded to a full 128-lane width
FIRST = 128
INPUT_SIZE = 256   # == output size

BATCH = 512        # aggregated batch (many samples per launch)
NCHUNKS = 2        # independent row chunks per tile (MXU/VPU/EUP interleave)


def decoder_kernel(z_ref, w1_ref, w2_ref, w3_ref, b_ref, o_ref):
    """Fused MLP decoder: (Linear->LeakyReLU)x2 (BN pre-folded) -> Linear -> Tanh*scalef."""
    # Packed biases (one aligned DMA): row 0 = b1 (padded), row 1 = b2, row 2 = b3.
    b1 = b_ref[0:1, 0:SECOND_PAD]
    b2 = b_ref[1:2, 0:FIRST]
    b3 = b_ref[2:3, :]

    # Resident weights.  w1 stays bf16 (z is streamed as bf16 -> bf16 x bf16 MXU
    # path); w2/w3 are upcast ONCE per grid step so the activations can stay f32
    # through the remaining matmuls (accuracy: only weight quantization remains).
    w1 = w1_ref[...]
    w2 = w2_ref[...].astype(jnp.float32)
    w3 = w3_ref[...].astype(jnp.float32)

    tb = o_ref.shape[0]
    ch = tb // NCHUNKS

    # Two statically-unrolled independent row chunks: the LLO scheduler can
    # overlap chunk-B matmul pushes with chunk-A LeakyReLU/tanh work.
    for c in range(NCHUNKS):
        rows = pl.ds(c * ch, ch)

        # ---- Block 1: Linear(THIRD -> SECOND_PAD) + LeakyReLU ---------------
        h = jnp.dot(z_ref[rows, :], w1, preferred_element_type=jnp.float32)
        h = h + b1
        h = jnp.where(h >= 0.0, h, RALPHA * h)      # padded lanes stay exactly 0

        # ---- Block 2: Linear(SECOND_PAD -> FIRST) + LeakyReLU (BN1 folded) --
        h = jnp.dot(h, w2, preferred_element_type=jnp.float32)
        h = h + b2
        h = jnp.where(h >= 0.0, h, RALPHA * h)

        # ---- Output: Linear(FIRST -> INPUT_SIZE) (BN2 folded) -> Tanh*scale -
        h = jnp.dot(h, w3, preferred_element_type=jnp.float32)
        h = h + b3
        o_ref[rows, :] = (jnp.tanh(h) * SCALEF).astype(o_ref.dtype)


def decoder_forward(z, kparams, *, tb=None, out_dtype=jnp.float32):
    """Batched decoder: 1-D grid over batch tiles; weights stay VMEM-resident.

    Tiling (per the perf review):
      * v7x (2 TensorCores): >=4 'parallel' steps so each core gets >=2 and
        still pipelines its own DMA against compute  -> default tb = batch // 4.
      * v5e / v6e (1 TensorCore): prefer a single fat step -> pass tb = batch.
    Streamed VMEM even at tb=1024 is ~2.3 MiB double-buffered, far under every
    generation's scoped default, so no vmem_limit_bytes override is needed.
    """
    w1, w2, w3, bpack = kparams
    batch = z.shape[0]
    if tb is None:
        tb = batch // 4 if batch >= 512 else batch
    assert batch % tb == 0, "batch must be a multiple of the batch tile"
    assert tb % (8 * NCHUNKS * 2) == 0, "tile must split into sublane-aligned chunks"
    grid = (batch // tb,)

    # Stream the input as bf16 (halves input DMA, removes a per-tile cast).
    z = z.astype(jnp.bfloat16)

    return pl.pallas_call(
        decoder_kernel,
        out_shape=jax.ShapeDtypeStruct((batch, INPUT_SIZE), out_dtype),
        grid=grid,
        in_specs=[
            pl.BlockSpec((tb, THIRD), lambda i: (i, 0)),            # streamed per tile
            pl.BlockSpec((THIRD, SECOND_PAD), lambda i: (0, 0)),    # resident (no re-DMA)
            pl.BlockSpec((SECOND_PAD, FIRST), lambda i: (0, 0)),    # resident
            pl.BlockSpec((FIRST, INPUT_SIZE), lambda i: (0, 0)),    # resident
            pl.BlockSpec((8, INPUT_SIZE), lambda i: (0, 0)),        # packed biases
        ],
        out_specs=pl.BlockSpec((tb, INPUT_SIZE), lambda i: (i, 0)),
        compiler_params=pltpu.CompilerParams(
            dimension_semantics=("parallel",)),                     # megacore-splittable
    )(z, w1, w2, w3, bpack)


# ----------------------------------------------------------------------------
# Parameter construction (PyTorch-shaped, then folded/packed for the kernel)
# ----------------------------------------------------------------------------
def make_raw_params(key):
    """Deterministic synthetic params; weights pre-transposed to (in, out)."""
    ks = jax.random.split(key, 16)

    def linear(kw, kb, fan_in, fan_out):
        w = jax.random.normal(kw, (fan_in, fan_out), jnp.float32) * (1.0 / jnp.sqrt(fan_in))
        b = jax.random.normal(kb, (1, fan_out), jnp.float32) * 0.05
        return w, b

    def bn(kg, kb, km, kv, dim):
        gamma = 1.0 + 0.1 * jax.random.normal(kg, (1, dim), jnp.float32)
        beta = 0.05 * jax.random.normal(kb, (1, dim), jnp.float32)
        mean = 0.1 * jax.random.normal(km, (1, dim), jnp.float32)
        var = 0.5 + jax.random.uniform(kv, (1, dim), jnp.float32)      # > 0
        return gamma, beta, mean, var

    w1, b1 = linear(ks[0], ks[1], THIRD, SECOND)
    g1, be1, m1, v1 = bn(ks[2], ks[3], ks[4], ks[5], SECOND)
    w2, b2 = linear(ks[6], ks[7], SECOND, FIRST)
    g2, be2, m2, v2 = bn(ks[8], ks[9], ks[10], ks[11], FIRST)
    w3, b3 = linear(ks[12], ks[13], FIRST, INPUT_SIZE)
    return (w1, b1, g1, be1, m1, v1, w2, b2, g2, be2, m2, v2, w3, b3)


def fold_and_pack(raw):
    """Fold eval-mode BN into the following Linear, pad SECOND to 128 lanes,
    cast weights to bf16, and pack the biases into one aligned array."""
    (w1, b1, g1, be1, m1, v1, w2, b2, g2, be2, m2, v2, w3, b3) = raw
    s1 = g1 * jax.lax.rsqrt(v1 + BN_EPS)
    t1 = be1 - m1 * s1
    s2 = g2 * jax.lax.rsqrt(v2 + BN_EPS)
    t2 = be2 - m2 * s2

    # BN1 folded into Linear2, BN2 folded into Linear3:
    #   (h*s + t) @ W + b  ==  h @ (diag(s) @ W) + (t @ W + b)
    w2f = s1.reshape(SECOND, 1) * w2              # (SECOND, FIRST)
    b2f = b2 + t1 @ w2                            # (1, FIRST)
    w3f = s2.reshape(FIRST, 1) * w3               # (FIRST, INPUT_SIZE)
    b3f = b3 + t2 @ w3                            # (1, INPUT_SIZE)

    # Zero-pad the 64-wide hidden dim to 128 lanes (zero cols of w1 / rows of w2f)
    # so h1 is lane-dense.  Keep this pad (review item): the extra K-rows are
    # free on all MXU geometries and cost only ~16 KB of one-time weight DMA.
    w1p = jnp.pad(w1, ((0, 0), (0, SECOND_PAD - SECOND)))
    b1p = jnp.pad(b1, ((0, 0), (0, SECOND_PAD - SECOND)))
    w2p = jnp.pad(w2f, ((0, SECOND_PAD - SECOND), (0, 0)))

    # Pack all biases (f32) into one sublane/lane-aligned array.
    bpack = jnp.zeros((8, INPUT_SIZE), jnp.float32)
    bpack = bpack.at[0, :SECOND_PAD].set(b1p[0])
    bpack = bpack.at[1, :FIRST].set(b2f[0])
    bpack = bpack.at[2, :].set(b3f[0])

    return (w1p.astype(jnp.bfloat16),
            w2p.astype(jnp.bfloat16),
            w3f.astype(jnp.bfloat16),
            bpack)


# ----------------------------------------------------------------------------
# Reference
# ----------------------------------------------------------------------------
def decoder_reference_f32(z, raw):
    """Pure-f32 JAX reference mirroring the PyTorch eval-mode forward (unfolded BN)."""
    (w1, b1, g1, be1, m1, v1, w2, b2, g2, be2, m2, v2, w3, b3) = raw
    s1 = g1 * jax.lax.rsqrt(v1 + BN_EPS); t1 = be1 - m1 * s1
    s2 = g2 * jax.lax.rsqrt(v2 + BN_EPS); t2 = be2 - m2 * s2
    h = z @ w1 + b1
    h = jnp.where(h >= 0.0, h, RALPHA * h)
    h = h * s1 + t1
    h = h @ w2 + b2
    h = jnp.where(h >= 0.0, h, RALPHA * h)
    h = h * s2 + t2
    h = h @ w3 + b3
    return jnp.tanh(h) * SCALEF


if __name__ == "__main__":
    key = jax.random.PRNGKey(0)
    kz, kp = jax.random.split(key)
    z = jax.random.normal(kz, (BATCH, THIRD), jnp.float32)

    raw = make_raw_params(kp)
    kparams = fold_and_pack(raw)

    # Default tiling: 4 'parallel' grid steps (v7x-friendly; fine on v5e/v6e).
    out = decoder_forward(z, kparams)
    out = jax.block_until_ready(out)
    assert out.shape == (BATCH, INPUT_SIZE)
    assert bool(jnp.all(jnp.isfinite(out)))
    assert bool(jnp.all(jnp.abs(out) <= SCALEF + 1e-3))   # tanh * scalef bound

    # Single-step variant (the v5e/v6e recommendation: one fat tile, grid=(1,)).
    out_single = decoder_forward(z, kparams, tb=BATCH)
    out_single = jax.block_until_ready(out_single)
    assert jnp.allclose(out, out_single, atol=1e-5, rtol=1e-5), "tiling changed results"

    # Semantic check against the full-f32 PyTorch-eval-mode reference.
    # Remaining error sources: bf16 weight / bf16 input quantization (activations
    # stay f32 in-kernel).  Observed error is typically well under these bounds;
    # the asserts keep the previously-validated conservative margin.
    ref_f32 = decoder_reference_f32(z, raw)
    err = jnp.abs(out - ref_f32)
    assert float(err.max()) < 2e-1, "max-abs mismatch vs f32 reference"
    assert float(err.mean()) < 5e-2, "mean-abs mismatch vs f32 reference"

    print("KERNEL_OK")
</pallas_src>

<mosaic_0001>
module attributes {stable_mosaic.version = 11 : i64} {
  func.func @decoder_kernel(%arg0: i32, %arg1: memref<128x32xbf16, #tpu.memory_space<vmem>>, %arg2: memref<32x128xbf16, #tpu.memory_space<vmem>>, %arg3: memref<128x128xbf16, #tpu.memory_space<vmem>>, %arg4: memref<128x256xbf16, #tpu.memory_space<vmem>>, %arg5: memref<8x256xf32, #tpu.memory_space<vmem>>, %arg6: memref<128x256xf32, #tpu.memory_space<vmem>>) attributes {dimension_semantics = [#tpu.dimension_semantics<parallel>], iteration_bounds = array<i64: 4>, scalar_prefetch = 0 : i64, scratch_operands = 0 : i64, tpu.core_type = #tpu.core_type<tc>, window_params = [{transform_indices = @transform_0, window_bounds = array<i64: 128, 32>}, {pipeline_mode = #tpu.pipeline_mode<synchronous>, transform_indices = @transform_1, window_bounds = array<i64: 32, 128>}, {pipeline_mode = #tpu.pipeline_mode<synchronous>, transform_indices = @transform_2, window_bounds = array<i64: 128, 128>}, {pipeline_mode = #tpu.pipeline_mode<synchronous>, transform_indices = @transform_3, window_bounds = array<i64: 128, 256>}, {pipeline_mode = #tpu.pipeline_mode<synchronous>, transform_indices = @transform_4, window_bounds = array<i64: 8, 256>}, {transform_indices = @transform_5, window_bounds = array<i64: 128, 256>}]} {
    %c0 = arith.constant 0 : index
    %c0_0 = arith.constant 0 : index
    %0 = vector.load %arg5[%c0, %c0_0] : memref<8x256xf32, #tpu.memory_space<vmem>>, vector<1x128xf32>
    %c1 = arith.constant 1 : index
    %c0_1 = arith.constant 0 : index
    %1 = vector.load %arg5[%c1, %c0_1] : memref<8x256xf32, #tpu.memory_space<vmem>>, vector<1x128xf32>
    %c2 = arith.constant 2 : index
    %c0_2 = arith.constant 0 : index
    %2 = vector.load %arg5[%c2, %c0_2] : memref<8x256xf32, #tpu.memory_space<vmem>>, vector<1x256xf32>
    %c0_3 = arith.constant 0 : index
    %c0_4 = arith.constant 0 : index
    %3 = vector.load %arg2[%c0_3, %c0_4] : memref<32x128xbf16, #tpu.memory_space<vmem>>, vector<32x128xbf16>
    %c0_5 = arith.constant 0 : index
    %c0_6 = arith.constant 0 : index
    %4 = vector.load %arg3[%c0_5, %c0_6] : memref<128x128xbf16, #tpu.memory_space<vmem>>, vector<128x128xbf16>
    %5 = arith.extf %4 : vector<128x128xbf16> to vector<128x128xf32>
    %c0_7 = arith.constant 0 : index
    %c0_8 = arith.constant 0 : index
    %6 = vector.load %arg4[%c0_7, %c0_8] : memref<128x256xbf16, #tpu.memory_space<vmem>>, vector<128x256xbf16>
    %7 = arith.extf %6 : vector<128x256xbf16> to vector<128x256xf32>
    %c0_9 = arith.constant 0 : index
    %c0_10 = arith.constant 0 : index
    %8 = vector.load %arg1[%c0_9, %c0_10] : memref<128x32xbf16, #tpu.memory_space<vmem>>, vector<64x32xbf16>
    %cst = arith.constant dense<0.000000e+00> : vector<64x128xf32>
    %9 = tpu.matmul %8, %3, %cst {dimension_numbers = #tpu.dot_dimension_numbers<[1], [0], [0], [1], [0, 0, 1, 1], [], []>} : vector<64x32xbf16>, vector<32x128xbf16>, vector<64x128xf32> -> vector<64x128xf32>
    %10 = vector.broadcast %0 : vector<1x128xf32> to vector<64x128xf32>
    %11 = arith.addf %9, %10 : vector<64x128xf32>
    %cst_11 = arith.constant 0.000000e+00 : f32
    %12 = vector.broadcast %cst_11 : f32 to vector<64x128xf32>
    %13 = arith.cmpf oge, %11, %12 : vector<64x128xf32>
    %cst_12 = arith.constant 2.000000e-01 : f32
    %14 = vector.broadcast %cst_12 : f32 to vector<64x128xf32>
    %15 = arith.mulf %14, %11 : vector<64x128xf32>
    %16 = arith.select %13, %11, %15 : vector<64x128xi1>, vector<64x128xf32>
    %cst_13 = arith.constant dense<0.000000e+00> : vector<64x128xf32>
    %17 = tpu.matmul %16, %5, %cst_13 {dimension_numbers = #tpu.dot_dimension_numbers<[1], [0], [0], [1], [0, 0, 1, 1], [], []>} : vector<64x128xf32>, vector<128x128xf32>, vector<64x128xf32> -> vector<64x128xf32>
    %18 = vector.broadcast %1 : vector<1x128xf32> to vector<64x128xf32>
    %19 = arith.addf %17, %18 : vector<64x128xf32>
    %cst_14 = arith.constant 0.000000e+00 : f32
    %20 = vector.broadcast %cst_14 : f32 to vector<64x128xf32>
    %21 = arith.cmpf oge, %19, %20 : vector<64x128xf32>
    %cst_15 = arith.constant 2.000000e-01 : f32
    %22 = vector.broadcast %cst_15 : f32 to vector<64x128xf32>
    %23 = arith.mulf %22, %19 : vector<64x128xf32>
    %24 = arith.select %21, %19, %23 : vector<64x128xi1>, vector<64x128xf32>
    %cst_16 = arith.constant dense<0.000000e+00> : vector<64x256xf32>
    %25 = tpu.matmul %24, %7, %cst_16 {dimension_numbers = #tpu.dot_dimension_numbers<[1], [0], [0], [1], [0, 0, 1, 1], [], []>} : vector<64x128xf32>, vector<128x256xf32>, vector<64x256xf32> -> vector<64x256xf32>
    %26 = vector.broadcast %2 : vector<1x256xf32> to vector<64x256xf32>
    %27 = arith.addf %25, %26 : vector<64x256xf32>
    %28 = math.tanh %27 : vector<64x256xf32>
    %cst_17 = arith.constant 2.000000e+00 : f32
    %29 = vector.broadcast %cst_17 : f32 to vector<64x256xf32>
    %30 = arith.mulf %28, %29 : vector<64x256xf32>
    %c0_18 = arith.constant 0 : index
    %c0_19 = arith.constant 0 : index
    %31 = vector.load %arg6[%c0_18, %c0_19] : memref<128x256xf32, #tpu.memory_space<vmem>>, vector<64x256xf32>
    tpu.vector_store %arg6[%c0_18, %c0_19], %30 {strides = array<i32>} : memref<128x256xf32, #tpu.memory_space<vmem>>, vector<64x256xf32>,
    %c64 = arith.constant 64 : index
    %c0_20 = arith.constant 0 : index
    %32 = vector.load %arg1[%c64, %c0_20] : memref<128x32xbf16, #tpu.memory_space<vmem>>, vector<64x32xbf16>
    %cst_21 = arith.constant dense<0.000000e+00> : vector<64x128xf32>
    %33 = tpu.matmul %32, %3, %cst_21 {dimension_numbers = #tpu.dot_dimension_numbers<[1], [0], [0], [1], [0, 0, 1, 1], [], []>} : vector<64x32xbf16>, vector<32x128xbf16>, vector<64x128xf32> -> vector<64x128xf32>
    %34 = vector.broadcast %0 : vector<1x128xf32> to vector<64x128xf32>
    %35 = arith.addf %33, %34 : vector<64x128xf32>
    %cst_22 = arith.constant 0.000000e+00 : f32
    %36 = vector.broadcast %cst_22 : f32 to vector<64x128xf32>
    %37 = arith.cmpf oge, %35, %36 : vector<64x128xf32>
    %cst_23 = arith.constant 2.000000e-01 : f32
    %38 = vector.broadcast %cst_23 : f32 to vector<64x128xf32>
    %39 = arith.mulf %38, %35 : vector<64x128xf32>
    %40 = arith.select %37, %35, %39 : vector<64x128xi1>, vector<64x128xf32>
    %cst_24 = arith.constant dense<0.000000e+00> : vector<64x128xf32>
    %41 = tpu.matmul %40, %5, %cst_24 {dimension_numbers = #tpu.dot_dimension_numbers<[1], [0], [0], [1], [0, 0, 1, 1], [], []>} : vector<64x128xf32>, vector<128x128xf32>, vector<64x128xf32> -> vector<64x128xf32>
    %42 = vector.broadcast %1 : vector<1x128xf32> to vector<64x128xf32>
    %43 = arith.addf %41, %42 : vector<64x128xf32>
    %cst_25 = arith.constant 0.000000e+00 : f32
    %44 = vector.broadcast %cst_25 : f32 to vector<64x128xf32>
    %45 = arith.cmpf oge, %43, %44 : vector<64x128xf32>
    %cst_26 = arith.constant 2.000000e-01 : f32
    %46 = vector.broadcast %cst_26 : f32 to vector<64x128xf32>
    %47 = arith.mulf %46, %43 : vector<64x128xf32>
    %48 = arith.select %45, %43, %47 : vector<64x128xi1>, vector<64x128xf32>
    %cst_27 = arith.constant dense<0.000000e+00> : vector<64x256xf32>
    %49 = tpu.matmul %48, %7, %cst_27 {dimension_numbers = #tpu.dot_dimension_numbers<[1], [0], [0], [1], [0, 0, 1, 1], [], []>} : vector<64x128xf32>, vector<128x256xf32>, vector<64x256xf32> -> vector<64x256xf32>
    %50 = vector.broadcast %2 : vector<1x256xf32> to vector<64x256xf32>
    %51 = arith.addf %49, %50 : vector<64x256xf32>
    %52 = math.tanh %51 : vector<64x256xf32>
    %cst_28 = arith.constant 2.000000e+00 : f32
    %53 = vector.broadcast %cst_28 : f32 to vector<64x256xf32>
    %54 = arith.mulf %52, %53 : vector<64x256xf32>
    %c64_29 = arith.constant 64 : index
    %c0_30 = arith.constant 0 : index
    %55 = vector.load %arg6[%c64_29, %c0_30] : memref<128x256xf32, #tpu.memory_space<vmem>>, vector<64x256xf32>
    tpu.vector_store %arg6[%c64_29, %c0_30], %54 {strides = array<i32>} : memref<128x256xf32, #tpu.memory_space<vmem>>, vector<64x256xf32>,
    return
  }
  func.func @transform_0(%arg0: i32) -> (i32, i32) {
    %c0_i32 = arith.constant 0 : i32
    %c0_i32_0 = arith.constant 0 : i32
    return %arg0, %c0_i32 : i32, i32
  }
  func.func @transform_1(%arg0: i32) -> (i32, i32) {
    %c0_i32 = arith.constant 0 : i32
    %c0_i32_0 = arith.constant 0 : i32
    %c0_i32_1 = arith.constant 0 : i32
    return %c0_i32, %c0_i32_0 : i32, i32
  }
  func.func @transform_2(%arg0: i32) -> (i32, i32) {
    %c0_i32 = arith.constant 0 : i32
    %c0_i32_0 = arith.constant 0 : i32
    %c0_i32_1 = arith.constant 0 : i32
    return %c0_i32, %c0_i32_0 : i32, i32
  }
  func.func @transform_3(%arg0: i32) -> (i32, i32) {
    %c0_i32 = arith.constant 0 : i32
    %c0_i32_0 = arith.constant 0 : i32
    %c0_i32_1 = arith.constant 0 : i32
    return %c0_i32, %c0_i32_0 : i32, i32
  }
  func.func @transform_4(%arg0: i32) -> (i32, i32) {
    %c0_i32 = arith.constant 0 : i32
    %c0_i32_0 = arith.constant 0 : i32
    %c0_i32_1 = arith.constant 0 : i32
    return %c0_i32, %c0_i32_0 : i32, i32
  }
  func.func @transform_5(%arg0: i32) -> (i32, i32) {
    %c0_i32 = arith.constant 0 : i32
    %c0_i32_0 = arith.constant 0 : i32
    return %arg0, %c0_i32 : i32, i32
  }
}

</mosaic_0001>

<bundles_post_ra>
// kernel: tpu_custom_call.1
= control target key start
LH: loop header
LB: loop body
LE: loop exit
PB: predicated region body
PF: predicated region fallthrough
CT: control target
= control target key end

     0   :  { %10 = vsyncpa [#allocation3], 0  ;;  %s1778_s0 = inlined_call_operand.vmem [shape: bf16[512,32], index: 0, kind: input, shape index: {}]   ;;  %s1779_s1 = inlined_call_operand.vmem [shape: bf16[32,128], index: 1, kind: input, shape index: {}]   ;;  %s1780_s2 = inlined_call_operand.vmem [shape: bf16[128,128], index: 2, kind: input, shape index: {}]   ;;  %s1781_s3 = inlined_call_operand.vmem [shape: bf16[128,256], index: 3, kind: input, shape index: {}]   ;;  %s1782_s4 = inlined_call_operand.vmem [shape: f32[8,256], index: 4, kind: input, shape index: {}]   ;;  %s1783_s5 = inlined_call_operand.hbm [shape: f32[512,256], index: 5, kind: output, shape index: {}]  }
   0x1   :  { %12 = vsyncpa [#allocation3 + $0x1], 0  ;;  %s1302_s18 = smov 0   ;;  %s1304_s19 = smov 0  }
   0x2   :  { %s1306_s20 = smov 0   ;;  %s1308_s21 = smov 0  }
   0x3 LB: > { %s1323_s22 = sadd.s32 4294967295, %s1268_s21   ;;  %s988_s23 = sadd.s32 4294967294, %s1268_s21   ;;  %s1268_s21 = sphi %s1308_s21, %s1789_s21   ;;  %s1264_s20 = sphi %s1306_s20, %s1788_s20   ;;  %s1260_s19 = sphi %s1304_s19, %s1787_s19   ;;  %s1256_s18 = sphi %s1302_s18, %s1786_s18  }
   0x4   : > { %s1327_s24 = sadd.s32 1, %s1268_s21   ;;  %s135_s25 = sadd.s32 1, %s1264_s20 }
   0x5   : > { %s132_s26 = ssub.s32 %s1268_s21, %s1327_s24  ;;  %p145_p0 = scmp.ne.s32.totalorder %s1264_s20, %s1260_s19 }
   0x6   : > { %p133_p1 = scmp.eq.s32.totalorder %s132_s26, 0  ;;  %p146_p2 = scmp.eq.s32.totalorder %s1323_s22, 3 }
   0x7   : > { %p151_p3 = scmp.ne.s32.totalorder %s1260_s19, %s1256_s18  ;;  %p152_p4 = scmp.eq.s32.totalorder %s988_s23, 3 }
   0x8   : > { %s1338_s27 = scalar_select %p133_p1, %s1264_s20, %s135_s25  }
   0x9   : > { %p1340_p5 = por %p146_p2, %p145_p0  ;;  %p1344_p6 = por %p152_p4, %p151_p3 }
   0xa   : > { %p991_p7 = scmp.ge.s32.totalorder %s1268_s21, 1  ;;  %p191_p8 = scmp.lt.s32.totalorder %s1268_s21, 5 }
   0xc   : > { %p192_p9 = pnand %p991_p7, %p191_p8 }
   0xd   : > { %s993_s7 = sshll.u32 (!%p192_p9), %s1323_s22, 4  ;;  %s216_s26 = sand.u32 (!%p192_p9), 1, %s1260_s19  }
   0xe   : > { %195 = sbr.rel (%p192_p9) target bundleno = 557 (0x22d), region = 40  ;;  %p220_p10 = scmp.lt.s32.totalorder (!%p192_p9), %s993_s7, 63 }
   0xf   : > { %s992_s30 = sshll.u32 (!%p192_p9), %s216_s26, 8  ;;  %s1226_s17 = scalar_lea.hbm (!%p192_p9), %s1783_s5, 1024 }
  0x10   : > { %s1682_s6 = scalar_lea.vmem (!%p192_p9), [#allocation2], %s992_s30 }
  0x11   : > { %s923_s11 = sshll.u32 (!%p192_p9), %s1682_s6, 4  ;;  %s924_s11 = int_to_ptr.vmem [resolvable:$true] %s923_s11 }
  0x13   : > { %v1051_v0 = vld [vmem:[%s1779_s1 + $0x8] sm:$0xff]  ;;  %v1050_v1 = vld [vmem:[%s1779_s1] sm:$0xff]  ;;  %s1791_s7 = smov (!%p220_p10, %s993_s7), 63  ;;  %vm355_vm0 = vcmask 261120   ;;  %v1100_v7 = vld [vmem:[%s1780_s2 + $0x38] sm:$0xff]  }
  0x14   : > { %374 = vmatpush.bf16.msra.mxu0 %v1051_v0  ;;  %s994_s10 = sshll.u32 %s1791_s7, 2  ;;  %v1099_v8 = vld [vmem:[%s1780_s2 + $0x30] sm:$0xff]   ;;  %v1093_v9 = vunpack.c.h.bf16 %v1100_v7  ;;  %v1092_v10 = vunpack.c.l.bf16 %v1100_v7  ;;  %v1098_v12 = vld [vmem:[%s1780_s2 + $0x28] sm:$0xff]   ;;  %v1097_v15 = vld [vmem:[%s1780_s2 + $0x20] sm:$0xff]   ;;  %s1061_s7 = sshll.u32 %s1323_s22, 8 }
  0x15   : > { %s1360_s13 = scalar_lea.vmem %s1778_s0, %s994_s10  ;;  %v1089_v11 = vunpack.c.h.bf16 %v1099_v8  ;;  %v1088_v13 = vunpack.c.l.bf16 %v1099_v8  ;;  %v1085_v14 = vunpack.c.h.bf16 %v1098_v12  ;;  %v1084_v16 = vunpack.c.l.bf16 %v1098_v12  ;;  %v1096_v20 = vld [vmem:[%s1780_s2 + $0x18] sm:$0xff]   ;;  %v1095_v22 = vld [vmem:[%s1780_s2 + $0x10] sm:$0xff]   ;;  %v1094_v25 = vld [vmem:[%s1780_s2 + $0x8] sm:$0xff]   ;;  %s922_s10 = scalar_lea.hbm %s1783_s5, %s1061_s7 }
  0x16   : > { %v1052_v2 = vld [vmem:[%s1360_s13] sm:$0xff]  ;;  %v1053_v3 = vld [vmem:[%s1360_s13 + $0x8] sm:$0xff]  ;;  %v1054_v4 = vld [vmem:[%s1360_s13 + $0x10] sm:$0xff]  ;;  %421 = vmatpush.msra.mxu1 %v1093_v9  ;;  %v1081_v17 = vunpack.c.h.bf16 %v1097_v15  ;;  %v1080_v19 = vunpack.c.l.bf16 %v1097_v15  ;;  %v1077_v21 = vunpack.c.h.bf16 %v1096_v20  ;;  %v1076_v23 = vunpack.c.l.bf16 %v1096_v20  ;;  %s925_s12 = sshll.u32 %s922_s10, 4  ;;  %s910_s22 = scalar_lea.sflag [#allocation3], %s216_s26  ;;  %s926_s12 = int_to_ptr.hbm [resolvable:$true] %s925_s12 }
  0x17   : > { %v1055_v5 = vld [vmem:[%s1360_s13 + $0x18] sm:$0xff]  ;;  %v1056_v6 = vld [vmem:[%s1360_s13 + $0x20] sm:$0xff]  ;;  %v1057_v18 = vld [vmem:[%s1360_s13 + $0x28] sm:$0xff]  ;;  %v1073_v24 = vunpack.c.h.bf16 %v1095_v22  ;;  %v1072_v26 = vunpack.c.l.bf16 %v1095_v22  ;;  %v1069_v27 = vunpack.c.h.bf16 %v1094_v25  ;;  %v1068_v29 = vunpack.c.l.bf16 %v1094_v25  ;;  %s1220_s14 = sshra.s32 %s926_s12, 4  ;;  %s1221_s14 = int_to_ptr.hbm [resolvable:$true] %s1220_s14 }
  0x18   : > { %375 = vmatpush.bf16.msra.mxu0 %v1050_v1  ;;  %422 = vmatpush.msra.mxu1 %v1092_v10  ;;  %v1058_v28 = vld [vmem:[%s1360_s13 + $0x30] sm:$0xff]  ;;  %v1063_v30 = vld [vmem:[%s1780_s2] sm:$0xff]   ;;  %v1059_v33 = vld [vmem:[%s1360_s13 + $0x38] sm:$0xff]  ;;  %s1222_s15 = scalar_lea.hbm %s1221_s14, 256  ;;  %p1227_p0 = scmp.lt.s32.totalorder %s1221_s14, %s1783_s5 }
  0x19   : > { %v1065_v31 = vunpack.c.h.bf16 %v1063_v30  ;;  %v1064_v32 = vunpack.c.l.bf16 %v1063_v30  ;;  %v1405_v34 = vld [vmem:[%s1782_s4] ss:$0 sm:$0xff]  ;;  %v1419_v7 = vld [vmem:[%s1781_s3 + $0x78] sm:$0xff]  ;;  %v1427_v12 = vld [vmem:[%s1781_s3 + $0x70] sm:$0xff]  ;;  %p1223_p11 = scmp.ne.s32.totalorder %s1221_s14, %s1222_s15  ;;  %p1228_p1 = scmp.lt.s32.totalorder %s1226_s17, %s1222_s15 }
  0x1a   : > { %423 = vmatpush.msra.mxu1 %v1089_v11  ;;  %v312_v15 = vunpack.c.h.bf16 %v1427_v12  ;;  %v1449_v20 = vld [vmem:[%s1781_s3 + $0x60] sm:$0xff] }
  0x1b   : > { %1020 = vmatmul.msk.bf16.vlgmr.msra.gmra.mxu0 %vm355_vm0, %v1052_v2  ;;  %v308_v22 = vunpack.c.h.bf16 %v1449_v20  ;;  %p1224_p12 = pnand %p1223_p11, %p1340_p5  ;;  %p1229_p2 = por %p1228_p1, %p1227_p0 }
  0x1c   : > { %667 = vmatpush.bf16.msrb.mxu0 %v1051_v0  ;;  %424 = vmatpush.msra.mxu1 %v1088_v13 }
  0x1d   : > { %p1225_p13 = pneg %p1224_p12 }
  0x1e   : > { %425 = vmatpush.msra.mxu1 %v1085_v14 }
  0x1f   : > { %p1230_p3 = pnand %p1229_p2, %p1225_p13 }
  0x20   : > { %668 = vmatpush.bf16.msrb.mxu0 %v1050_v1  ;;  %426 = vmatpush.msra.mxu1 %v1084_v16 }
  0x22   : > { %427 = vmatpush.msra.mxu1 %v1081_v17 }
  0x24   : > { %428 = vmatpush.msra.mxu1 %v1080_v19 }
  0x26   : > { %429 = vmatpush.msra.mxu1 %v1077_v21 }
  0x28   : > { %430 = vmatpush.msra.mxu1 %v1076_v23 }
  0x2a   : > { %431 = vmatpush.msra.mxu1 %v1073_v24 }
  0x2b   : > { %1021 = vmatmul.msk.bf16.gmra.mxu0 %vm355_vm0, %v1053_v3 }
  0x2c   : > { %432 = vmatpush.msra.mxu1 %v1072_v26 }
  0x2e   : > { %433 = vmatpush.msra.mxu1 %v1069_v27 }
  0x30   : > { %434 = vmatpush.msra.mxu1 %v1068_v29 }
  0x32   : > { %435 = vmatpush.msra.mxu1 %v1065_v31 }
  0x34   : > { %436 = vmatpush.msra.mxu1 %v1064_v32 }
  0x36   : > { %714 = vmatpush.msrb.mxu1 %v1093_v9  ;;  %v313_v9 = vunpack.c.l.bf16 %v1419_v7 }
  0x38   : > { %715 = vmatpush.msrb.mxu1 %v1092_v10  ;;  %v314_v10 = vunpack.c.h.bf16 %v1419_v7  ;;  %491 = vmatpush.msra.mxu2 %v313_v9 }
  0x3a   : > { %716 = vmatpush.msrb.mxu1 %v1089_v11  ;;  %532 = vmatpush.msra.mxu3 %v314_v10 }
  0x3b   : > { %1022 = vmatmul.msk.bf16.gmra.mxu0 %vm355_vm0, %v1054_v4 }
  0x3c   : > { %717 = vmatpush.msrb.mxu1 %v1088_v13  ;;  %v1432_v13 = vld [vmem:[%s1781_s3 + $0x68] sm:$0xff]  ;;  %533 = vmatpush.msra.mxu3 %v312_v15 }
  0x3e   : > { %718 = vmatpush.msrb.mxu1 %v1085_v14  ;;  %v311_v14 = vunpack.c.l.bf16 %v1427_v12 }
  0x40   : > { %719 = vmatpush.msrb.mxu1 %v1084_v16  ;;  %v309_v16 = vunpack.c.l.bf16 %v1432_v13  ;;  %492 = vmatpush.msra.mxu2 %v311_v14 }
  0x42   : > { %720 = vmatpush.msrb.mxu1 %v1081_v17  ;;  %493 = vmatpush.msra.mxu2 %v309_v16 }
  0x44   : > { %721 = vmatpush.msrb.mxu1 %v1080_v19 }
  0x46   : > { %722 = vmatpush.msrb.mxu1 %v1077_v21  ;;  %v307_v21 = vunpack.c.l.bf16 %v1449_v20 }
  0x48   : > { %723 = vmatpush.msrb.mxu1 %v1076_v23  ;;  %v1460_v23 = vld [vmem:[%s1781_s3 + $0x58] sm:$0xff]  ;;  %494 = vmatpush.msra.mxu2 %v307_v21 }
  0x49   : > { %v305_v25 = vunpack.c.l.bf16 %v1460_v23 }
  0x4a   : > { %724 = vmatpush.msrb.mxu1 %v1073_v24 }
  0x4b   : > { %1023 = vmatmul.msk.bf16.gmra.mxu0 %vm355_vm0, %v1055_v5  ;;  %495 = vmatpush.msra.mxu2 %v305_v25 }
  0x4c   : > { %725 = vmatpush.msrb.mxu1 %v1072_v26  ;;  %v306_v26 = vunpack.c.h.bf16 %v1460_v23 }
  0x4e   : > { %726 = vmatpush.msrb.mxu1 %v1069_v27 }
  0x50   : > { %727 = vmatpush.msrb.mxu1 %v1068_v29  ;;  %v1477_v29 = vld [vmem:[%s1781_s3 + $0x48] sm:$0xff] }
  0x52   : > { %728 = vmatpush.msrb.mxu1 %v1065_v31 }
  0x54   : > { %729 = vmatpush.msrb.mxu1 %v1064_v32  ;;  %v301_v32 = vunpack.c.l.bf16 %v1477_v29 }
  0x5b   : > { %1040 = vmatmul.msk.bf16.vlgmr.msrb.gmra.mxu0 %vm355_vm0, %v1056_v6 }
  0x6b   : > { %1041 = vmatmul.msk.bf16.gmra.mxu0 %vm355_vm0, %v1057_v18  ;;  %v310_v18 = vunpack.c.h.bf16 %v1432_v13 }
  0x6d   : > { %534 = vmatpush.msra.mxu3 %v310_v18 }
  0x6f   : > { %535 = vmatpush.msra.mxu3 %v308_v22 }
  0x71   : > { %536 = vmatpush.msra.mxu3 %v306_v26 }
  0x7b   : > { %1042 = vmatmul.msk.bf16.gmra.mxu0 %vm355_vm0, %v1058_v28  ;;  %v1472_v28 = vld [vmem:[%s1781_s3 + $0x50] sm:$0xff] }
  0x7c   : > { %v303_v30 = vunpack.c.l.bf16 %v1472_v28  ;;  %v304_v31 = vunpack.c.h.bf16 %v1472_v28 }
  0x7e   : > { %496 = vmatpush.msra.mxu2 %v303_v30  ;;  %537 = vmatpush.msra.mxu3 %v304_v31 }
  0x80   : > { %497 = vmatpush.msra.mxu2 %v301_v32 }
  0x8b   : > { %1043 = vmatmul.msk.bf16.gmra.mxu0 %vm355_vm0, %v1059_v33 }
  0x98   : > { %v377_v35 = vpop.f32.mrf.mxu0 }
  0x99   : > { %v378_v36 = vadd.f32 %v377_v35, %v1405_v34  ;;  %v302_v35 = vunpack.c.h.bf16 %v1477_v29 }
  0x9b   : > { %vm397_vm1 = vcmp.ge.f32.partialorder %v378_v36, 0.0  ;;  %v405_v37 = vmul.f32 0.2, %v378_v36  ;;  %538 = vmatpush.msra.mxu3 %v302_v35 }
  0x9d   : > { %v413_v38 = vsel %vm397_vm1, %v378_v36, %v405_v37  ;;  %v1494_v37 = vld [vmem:[%s1781_s3 + $0x40] sm:$0xff] }
  0x9e   : > { %437 = vmatmul.f32.vlgmr.msra.gmra.mxu1 %v413_v38  ;;  %v299_v38 = vunpack.c.l.bf16 %v1494_v37 }
  0xa0   : > { %v379_v39 = vpop.f32.mrf.mxu0  ;;  %498 = vmatpush.msra.mxu2 %v299_v38 }
  0xa1   : > { %v380_v40 = vadd.f32 %v379_v39, %v1405_v34  ;;  %v300_v39 = vunpack.c.h.bf16 %v1494_v37 }
  0xa3   : > { %vm398_vm2 = vcmp.ge.f32.partialorder %v380_v40, 0.0  ;;  %v406_v41 = vmul.f32 0.2, %v380_v40  ;;  %539 = vmatpush.msra.mxu3 %v300_v39 }
  0xa5   : > { %v414_v42 = vsel %vm398_vm2, %v380_v40, %v406_v41  ;;  %v1505_v40 = vld [vmem:[%s1781_s3 + $0x38] sm:$0xff] }
  0xa6   : > { %440 = vmatmul.f32.gmra.mxu1 %v414_v42  ;;  %v297_v42 = vunpack.c.l.bf16 %v1505_v40 }
  0xa8   : > { %v382_v43 = vpop.f32.mrf.mxu0  ;;  %499 = vmatpush.msra.mxu2 %v297_v42 }
  0xa9   : > { %v383_v44 = vadd.f32 %v382_v43, %v1405_v34  ;;  %v298_v43 = vunpack.c.h.bf16 %v1505_v40 }
  0xab   : > { %vm399_vm3 = vcmp.ge.f32.partialorder %v383_v44, 0.0  ;;  %v407_v45 = vmul.f32 0.2, %v383_v44  ;;  %540 = vmatpush.msra.mxu3 %v298_v43 }
  0xad   : > { %v415_v46 = vsel %vm399_vm3, %v383_v44, %v407_v45  ;;  %v1517_v45 = vld [vmem:[%s1781_s3 + $0x30] sm:$0xff] }
  0xae   : > { %443 = vmatmul.f32.gmra.mxu1 %v415_v46  ;;  %v1522_v46 = vld [vmem:[%s1781_s3 + $0x28] sm:$0xff] }
  0xb0   : > { %v384_v47 = vpop.f32.mrf.mxu0 }
  0xb1   : > { %v385_v48 = vadd.f32 %v384_v47, %v1405_v34  ;;  %v295_v47 = vunpack.c.l.bf16 %v1517_v45 }
  0xb3   : > { %vm400_vm4 = vcmp.ge.f32.partialorder %v385_v48, 0.0  ;;  %v408_v49 = vmul.f32 0.2, %v385_v48  ;;  %500 = vmatpush.msra.mxu2 %v295_v47 }
  0xb5   : > { %v416_v50 = vsel %vm400_vm4, %v385_v48, %v408_v49  ;;  %v296_v48 = vunpack.c.h.bf16 %v1517_v45  ;;  %v293_v49 = vunpack.c.l.bf16 %v1522_v46 }
  0xb6   : > { %446 = vmatmul.f32.gmra.mxu1 %v416_v50 }
  0xb7   : > { %541 = vmatpush.msra.mxu3 %v296_v48  ;;  %501 = vmatpush.msra.mxu2 %v293_v49 }
  0xb8   : > { %v387_v51 = vpop.f32.mrf.mxu0 }
  0xb9   : > { %v388_v52 = vadd.f32 %v387_v51, %v1405_v34  ;;  %v294_v51 = vunpack.c.h.bf16 %v1522_v46 }
  0xbb   : > { %vm401_vm5 = vcmp.ge.f32.partialorder %v388_v52, 0.0  ;;  %v409_v53 = vmul.f32 0.2, %v388_v52  ;;  %542 = vmatpush.msra.mxu3 %v294_v51 }
  0xbd   : > { %v417_v54 = vsel %vm401_vm5, %v388_v52, %v409_v53  ;;  %v1539_v53 = vld [vmem:[%s1781_s3 + $0x20] sm:$0xff] }
  0xbe   : > { %449 = vmatmul.f32.gmra.mxu1 %v417_v54  ;;  %v291_v54 = vunpack.c.l.bf16 %v1539_v53 }
  0xc0   : > { %v389_v55 = vpop.f32.mrf.mxu0  ;;  %502 = vmatpush.msra.mxu2 %v291_v54 }
  0xc1   : > { %v390_v56 = vadd.f32 %v389_v55, %v1405_v34  ;;  %v292_v55 = vunpack.c.h.bf16 %v1539_v53 }
  0xc3   : > { %vm402_vm6 = vcmp.ge.f32.partialorder %v390_v56, 0.0  ;;  %v410_v57 = vmul.f32 0.2, %v390_v56  ;;  %543 = vmatpush.msra.mxu3 %v292_v55 }
  0xc5   : > { %v418_v58 = vsel %vm402_vm6, %v390_v56, %v410_v57  ;;  %v1548_v56 = vld [vmem:[%s1781_s3 + $0x18] sm:$0xff] }
  0xc6   : > { %452 = vmatmul.f32.gmra.mxu1 %v418_v58  ;;  %v289_v57 = vunpack.c.l.bf16 %v1548_v56  ;;  %v290_v58 = vunpack.c.h.bf16 %v1548_v56 }
  0xc8   : > { %v392_v59 = vpop.f32.mrf.mxu0  ;;  %503 = vmatpush.msra.mxu2 %v289_v57  ;;  %544 = vmatpush.msra.mxu3 %v290_v58 }
  0xc9   : > { %v393_v60 = vadd.f32 %v392_v59, %v1405_v34 }
  0xcb   : > { %vm403_vm7 = vcmp.ge.f32.partialorder %v393_v60, 0.0  ;;  %v411_v61 = vmul.f32 0.2, %v393_v60 }
  0xcd   : > { %v419_v62 = vsel %vm403_vm7, %v393_v60, %v411_v61  ;;  %v1562_v61 = vld [vmem:[%s1781_s3 + $0x10] sm:$0xff] }
  0xce   : > { %455 = vmatmul.f32.gmra.mxu1 %v419_v62  ;;  %v287_v62 = vunpack.c.l.bf16 %v1562_v61 }
  0xd0   : > { %v394_v63 = vpop.f32.mrf.mxu0  ;;  %504 = vmatpush.msra.mxu2 %v287_v62 }
  0xd1   : > { %v395_v0 = vadd.f32 %v394_v63, %v1405_v34  ;;  %v288_v63 = vunpack.c.h.bf16 %v1562_v61 }
  0xd3   : > { %vm404_vm8 = vcmp.ge.f32.partialorder %v395_v0, 0.0  ;;  %v412_v1 = vmul.f32 0.2, %v395_v0  ;;  %545 = vmatpush.msra.mxu3 %v288_v63 }
  0xd5   : > { %v420_v2 = vsel %vm404_vm8, %v395_v0, %v412_v1  ;;  %v1573_v1 = vld [vmem:[%s1781_s3 + $0x8] sm:$0xff] }
  0xd6   : > { %458 = vmatmul.f32.gmra.mxu1 %v420_v2  ;;  %v285_v2 = vunpack.c.l.bf16 %v1573_v1 }
  0xd8   : > { %v670_v3 = vpop.f32.mrf.mxu0  ;;  %505 = vmatpush.msra.mxu2 %v285_v2 }
  0xd9   : > { %v671_v4 = vadd.f32 %v670_v3, %v1405_v34  ;;  %v286_v3 = vunpack.c.h.bf16 %v1573_v1 }
  0xdb   : > { %v698_v5 = vmul.f32 0.2, %v671_v4  ;;  %vm690_vm9 = vcmp.ge.f32.partialorder %v671_v4, 0.0  ;;  %546 = vmatpush.msra.mxu3 %v286_v3 }
  0xdd   : > { %v706_v6 = vsel %vm690_vm9, %v671_v4, %v698_v5  ;;  %v1582_v4 = vld [vmem:[%s1781_s3] sm:$0xff] }
  0xde   : > { %730 = vmatmul.f32.vlgmr.msrb.gmra.mxu1 %v706_v6  ;;  %v283_v6 = vunpack.c.l.bf16 %v1582_v4 }
  0xe0   : > { %v672_v8 = vpop.f32.mrf.mxu0  ;;  %506 = vmatpush.msra.mxu2 %v283_v6 }
  0xe1   : > { %v673_v11 = vadd.f32 %v672_v8, %v1405_v34  ;;  %v284_v8 = vunpack.c.h.bf16 %v1582_v4 }
  0xe2   : > { %779 = vmatpush.msrb.mxu2 %v313_v9 }
  0xe3   : > { %vm691_vm10 = vcmp.ge.f32.partialorder %v673_v11, 0.0  ;;  %v699_v17 = vmul.f32 0.2, %v673_v11  ;;  %547 = vmatpush.msra.mxu3 %v284_v8 }
  0xe4   : > { %780 = vmatpush.msrb.mxu2 %v311_v14 }
  0xe5   : > { %v707_v19 = vsel %vm691_vm10, %v673_v11, %v699_v17  ;;  %820 = vmatpush.msrb.mxu3 %v314_v10 }
  0xe6   : > { %733 = vmatmul.f32.gmra.mxu1 %v707_v19  ;;  %781 = vmatpush.msrb.mxu2 %v309_v16 }
  0xe7   : > { %821 = vmatpush.msrb.mxu3 %v312_v15 }
  0xe8   : > { %v675_v24 = vpop.f32.mrf.mxu0  ;;  %782 = vmatpush.msrb.mxu2 %v307_v21 }
  0xe9   : > { %v676_v27 = vadd.f32 %v675_v24, %v1405_v34  ;;  %822 = vmatpush.msrb.mxu3 %v310_v18 }
  0xea   : > { %783 = vmatpush.msrb.mxu2 %v305_v25 }
  0xeb   : > { %vm692_vm11 = vcmp.ge.f32.partialorder %v676_v27, 0.0  ;;  %v700_v33 = vmul.f32 0.2, %v676_v27  ;;  %823 = vmatpush.msrb.mxu3 %v308_v22 }
  0xec   : > { %784 = vmatpush.msrb.mxu2 %v303_v30 }
  0xed   : > { %v708_v36 = vsel %vm692_vm11, %v676_v27, %v700_v33  ;;  %824 = vmatpush.msrb.mxu3 %v306_v26 }
  0xee   : > { %736 = vmatmul.f32.gmra.mxu1 %v708_v36  ;;  %785 = vmatpush.msrb.mxu2 %v301_v32 }
  0xef   : > { %825 = vmatpush.msrb.mxu3 %v304_v31 }
  0xf0   : > { %v677_v41 = vpop.f32.mrf.mxu0  ;;  %786 = vmatpush.msrb.mxu2 %v299_v38 }
  0xf1   : > { %v678_v44 = vadd.f32 %v677_v41, %v1405_v34  ;;  %826 = vmatpush.msrb.mxu3 %v302_v35 }
  0xf2   : > { %787 = vmatpush.msrb.mxu2 %v297_v42 }
  0xf3   : > { %vm693_vm12 = vcmp.ge.f32.partialorder %v678_v44, 0.0  ;;  %v701_v50 = vmul.f32 0.2, %v678_v44  ;;  %827 = vmatpush.msrb.mxu3 %v300_v39 }
  0xf4   : > { %788 = vmatpush.msrb.mxu2 %v295_v47 }
  0xf5   : > { %v709_v52 = vsel %vm693_vm12, %v678_v44, %v701_v50  ;;  %828 = vmatpush.msrb.mxu3 %v298_v43 }
  0xf6   : > { %739 = vmatmul.f32.gmra.mxu1 %v709_v52  ;;  %789 = vmatpush.msrb.mxu2 %v293_v49 }
  0xf7   : > { %829 = vmatpush.msrb.mxu3 %v296_v48 }
  0xf8   : > { %v680_v59 = vpop.f32.mrf.mxu0  ;;  %790 = vmatpush.msrb.mxu2 %v291_v54 }
  0xf9   : > { %v681_v60 = vadd.f32 %v680_v59, %v1405_v34  ;;  %830 = vmatpush.msrb.mxu3 %v294_v51 }
  0xfa   : > { %791 = vmatpush.msrb.mxu2 %v289_v57 }
  0xfb   : > { %vm694_vm13 = vcmp.ge.f32.partialorder %v681_v60, 0.0  ;;  %v702_v0 = vmul.f32 0.2, %v681_v60  ;;  %831 = vmatpush.msrb.mxu3 %v292_v55 }
  0xfc   : > { %792 = vmatpush.msrb.mxu2 %v287_v62 }
  0xfd   : > { %v710_v5 = vsel %vm694_vm13, %v681_v60, %v702_v0  ;;  %832 = vmatpush.msrb.mxu3 %v290_v58 }
  0xfe   : > { %742 = vmatmul.f32.gmra.mxu1 %v710_v5  ;;  %793 = vmatpush.msrb.mxu2 %v285_v2 }
  0xff   : > { %833 = vmatpush.msrb.mxu3 %v288_v63 }
 0x100   : > { %v682_v11 = vpop.f32.mrf.mxu0  ;;  %794 = vmatpush.msrb.mxu2 %v283_v6 }
 0x101   : > { %v683_v17 = vadd.f32 %v682_v11, %v1405_v34  ;;  %834 = vmatpush.msrb.mxu3 %v286_v3 }
 0x103   : > { %vm695_vm14 = vcmp.ge.f32.partialorder %v683_v17, 0.0  ;;  %v703_v19 = vmul.f32 0.2, %v683_v17  ;;  %835 = vmatpush.msrb.mxu3 %v284_v8 }
 0x105   : > { %v711_v24 = vsel %vm695_vm14, %v683_v17, %v703_v19 }
 0x106   : > { %745 = vmatmul.f32.gmra.mxu1 %v711_v24 }
 0x108   : > { %v685_v7 = vpop.f32.mrf.mxu0 }
 0x109   : > { %v686_v9 = vadd.f32 %v685_v7, %v1405_v34 }
 0x10b   : > { %vm696_vm15 = vcmp.ge.f32.partialorder %v686_v9, 0.0  ;;  %v704_v10 = vmul.f32 0.2, %v686_v9 }
 0x10d   : > { %v712_v12 = vsel %vm696_vm15, %v686_v9, %v704_v10 }
 0x10e   : > { %748 = vmatmul.f32.gmra.mxu1 %v712_v12 }
 0x110   : > { %v687_v13 = vpop.f32.mrf.mxu0 }
 0x111   : > { %v688_v14 = vadd.f32 %v687_v13, %v1405_v34  ;;  %v1642_v34 = vld [vmem:[%s1782_s4 + $0x1] ss:$0 sm:$0xff] }
 0x113   : > { %vm697_vm0 = vcmp.ge.f32.partialorder %v688_v14, 0.0  ;;  %v705_v15 = vmul.f32 0.2, %v688_v14 }
 0x115   : > { %v713_v16 = vsel %vm697_vm0, %v688_v14, %v705_v15 }
 0x116   : > { %751 = vmatmul.f32.gmra.mxu1 %v713_v16 }
 0x11b   : > { %v438_v18 = vpop.f32.mrf.mxu1 }
 0x11c   : > { %v439_v20 = vadd.f32 %v438_v18, %v1642_v34 }
 0x11e   : > { %vm462_vm1 = vcmp.ge.f32.partialorder %v439_v20, 0.0  ;;  %v470_v21 = vmul.f32 0.2, %v439_v20 }
 0x120   : > { %v478_v22 = vsel %vm462_vm1, %v439_v20, %v470_v21  ;;  %v995_v20 = vld [vmem:[%s1782_s4 + $0x2] ss:$8 sm:$0x3] }
 0x121   : > { %507 = vmatmul.f32.vlgmr.msra.gmra.mxu2 %v478_v22  ;;  %548 = vmatmul.f32.vlgmr.msra.gmra.mxu3 %v478_v22  ;;  %v1671_v21 = vperm.slane %v995_v20, 0  ;;  %v1673_v22 = vperm.slane %v995_v20, 1 }
 0x123   : > { %v441_v23 = vpop.f32.mrf.mxu1 }
 0x124   : > { %v442_v25 = vadd.f32 %v441_v23, %v1642_v34 }
 0x126   : > { %vm463_vm2 = vcmp.ge.f32.partialorder %v442_v25, 0.0  ;;  %v471_v26 = vmul.f32 0.2, %v442_v25 }
 0x128   : > { %v479_v27 = vsel %vm463_vm2, %v442_v25, %v471_v26 }
 0x129   : > { %510 = vmatmul.f32.gmra.mxu2 %v479_v27  ;;  %551 = vmatmul.f32.gmra.mxu3 %v479_v27 }
 0x12b   : > { %v444_v28 = vpop.f32.mrf.mxu1 }
 0x12c   : > { %v445_v29 = vadd.f32 %v444_v28, %v1642_v34 }
 0x12e   : > { %vm464_vm3 = vcmp.ge.f32.partialorder %v445_v29, 0.0  ;;  %v472_v30 = vmul.f32 0.2, %v445_v29 }
 0x130   : > { %v480_v31 = vsel %vm464_vm3, %v445_v29, %v472_v30 }
 0x131   : > { %513 = vmatmul.f32.gmra.mxu2 %v480_v31  ;;  %554 = vmatmul.f32.gmra.mxu3 %v480_v31 }
 0x133   : > { %v447_v32 = vpop.f32.mrf.mxu1 }
 0x134   : > { %v448_v33 = vadd.f32 %v447_v32, %v1642_v34 }
 0x136   : > { %vm465_vm4 = vcmp.ge.f32.partialorder %v448_v33, 0.0  ;;  %v473_v35 = vmul.f32 0.2, %v448_v33 }
 0x138   : > { %v481_v36 = vsel %vm465_vm4, %v448_v33, %v473_v35 }
 0x139   : > { %516 = vmatmul.f32.gmra.mxu2 %v481_v36  ;;  %557 = vmatmul.f32.gmra.mxu3 %v481_v36 }
 0x13b   : > { %v450_v37 = vpop.f32.mrf.mxu1 }
 0x13c   : > { %v451_v38 = vadd.f32 %v450_v37, %v1642_v34 }
 0x13e   : > { %vm466_vm5 = vcmp.ge.f32.partialorder %v451_v38, 0.0  ;;  %v474_v39 = vmul.f32 0.2, %v451_v38 }
 0x140   : > { %v482_v40 = vsel %vm466_vm5, %v451_v38, %v474_v39 }
 0x141   : > { %519 = vmatmul.f32.gmra.mxu2 %v482_v40  ;;  %560 = vmatmul.f32.gmra.mxu3 %v482_v40 }
 0x143   : > { %v453_v41 = vpop.f32.mrf.mxu1 }
 0x144   : > { %v454_v42 = vadd.f32 %v453_v41, %v1642_v34 }
 0x146   : > { %vm467_vm6 = vcmp.ge.f32.partialorder %v454_v42, 0.0  ;;  %v475_v43 = vmul.f32 0.2, %v454_v42 }
 0x148   : > { %v483_v44 = vsel %vm467_vm6, %v454_v42, %v475_v43 }
 0x149   : > { %522 = vmatmul.f32.gmra.mxu2 %v483_v44  ;;  %563 = vmatmul.f32.gmra.mxu3 %v483_v44 }
 0x14b   : > { %v456_v45 = vpop.f32.mrf.mxu1 }
 0x14c   : > { %v457_v46 = vadd.f32 %v456_v45, %v1642_v34 }
 0x14e   : > { %vm468_vm7 = vcmp.ge.f32.partialorder %v457_v46, 0.0  ;;  %v476_v47 = vmul.f32 0.2, %v457_v46 }
 0x150   : > { %v484_v48 = vsel %vm468_vm7, %v457_v46, %v476_v47 }
 0x151   : > { %525 = vmatmul.f32.gmra.mxu2 %v484_v48  ;;  %566 = vmatmul.f32.gmra.mxu3 %v484_v48 }
 0x153   : > { %v459_v49 = vpop.f32.mrf.mxu1 }
 0x154   : > { %v460_v50 = vadd.f32 %v459_v49, %v1642_v34 }
 0x156   : > { %vm469_vm8 = vcmp.ge.f32.partialorder %v460_v50, 0.0  ;;  %v477_v51 = vmul.f32 0.2, %v460_v50 }
 0x158   : > { %v485_v52 = vsel %vm469_vm8, %v460_v50, %v477_v51 }
 0x159   : > { %528 = vmatmul.f32.gmra.mxu2 %v485_v52  ;;  %569 = vmatmul.f32.gmra.mxu3 %v485_v52 }
 0x15b   : > { %v731_v53 = vpop.f32.mrf.mxu1 }
 0x15c   : > { %v732_v54 = vadd.f32 %v731_v53, %v1642_v34 }
 0x15e   : > { %v763_v55 = vmul.f32 0.2, %v732_v54  ;;  %vm755_vm9 = vcmp.ge.f32.partialorder %v732_v54, 0.0 }
 0x160   : > { %v771_v56 = vsel %vm755_vm9, %v732_v54, %v763_v55 }
 0x161   : > { %795 = vmatmul.f32.vlgmr.msrb.gmra.mxu2 %v771_v56  ;;  %836 = vmatmul.f32.vlgmr.msrb.gmra.mxu3 %v771_v56 }
 0x163   : > { %v734_v57 = vpop.f32.mrf.mxu1 }
 0x164   : > { %v735_v58 = vadd.f32 %v734_v57, %v1642_v34 }
 0x166   : > { %vm756_vm10 = vcmp.ge.f32.partialorder %v735_v58, 0.0  ;;  %v764_v59 = vmul.f32 0.2, %v735_v58 }
 0x168   : > { %v772_v60 = vsel %vm756_vm10, %v735_v58, %v764_v59 }
 0x169   : > { %798 = vmatmul.f32.gmra.mxu2 %v772_v60  ;;  %839 = vmatmul.f32.gmra.mxu3 %v772_v60 }
 0x16b   : > { %v737_v61 = vpop.f32.mrf.mxu1 }
 0x16c   : > { %v738_v62 = vadd.f32 %v737_v61, %v1642_v34 }
 0x16e   : > { %vm757_vm11 = vcmp.ge.f32.partialorder %v738_v62, 0.0  ;;  %v765_v63 = vmul.f32 0.2, %v738_v62 }
 0x170   : > { %v773_v0 = vsel %vm757_vm11, %v738_v62, %v765_v63 }
 0x171   : > { %801 = vmatmul.f32.gmra.mxu2 %v773_v0  ;;  %842 = vmatmul.f32.gmra.mxu3 %v773_v0 }
 0x173   : > { %v740_v1 = vpop.f32.mrf.mxu1 }
 0x174   : > { %v741_v2 = vadd.f32 %v740_v1, %v1642_v34 }
 0x176   : > { %vm758_vm12 = vcmp.ge.f32.partialorder %v741_v2, 0.0  ;;  %v766_v3 = vmul.f32 0.2, %v741_v2 }
 0x178   : > { %v774_v4 = vsel %vm758_vm12, %v741_v2, %v766_v3 }
 0x179   : > { %804 = vmatmul.f32.gmra.mxu2 %v774_v4  ;;  %845 = vmatmul.f32.gmra.mxu3 %v774_v4 }
 0x17b   : > { %v743_v5 = vpop.f32.mrf.mxu1 }
 0x17c   : > { %v744_v6 = vadd.f32 %v743_v5, %v1642_v34 }
 0x17e   : > { %vm759_vm13 = vcmp.ge.f32.partialorder %v744_v6, 0.0  ;;  %v767_v8 = vmul.f32 0.2, %v744_v6 }
 0x180   : > { %v775_v11 = vsel %vm759_vm13, %v744_v6, %v767_v8 }
 0x181   : > { %807 = vmatmul.f32.gmra.mxu2 %v775_v11  ;;  %848 = vmatmul.f32.gmra.mxu3 %v775_v11 }
 0x183   : > { %v746_v17 = vpop.f32.mrf.mxu1 }
 0x184   : > { %v747_v19 = vadd.f32 %v746_v17, %v1642_v34 }
 0x186   : > { %vm760_vm14 = vcmp.ge.f32.partialorder %v747_v19, 0.0  ;;  %v768_v24 = vmul.f32 0.2, %v747_v19 }
 0x188   : > { %v776_v7 = vsel %vm760_vm14, %v747_v19, %v768_v24 }
 0x189   : > { %810 = vmatmul.f32.gmra.mxu2 %v776_v7  ;;  %851 = vmatmul.f32.gmra.mxu3 %v776_v7 }
 0x18b   : > { %v749_v9 = vpop.f32.mrf.mxu1 }
 0x18c   : > { %v750_v10 = vadd.f32 %v749_v9, %v1642_v34 }
 0x18e   : > { %vm761_vm15 = vcmp.ge.f32.partialorder %v750_v10, 0.0  ;;  %v769_v12 = vmul.f32 0.2, %v750_v10 }
 0x190   : > { %v777_v13 = vsel %vm761_vm15, %v750_v10, %v769_v12 }
 0x191   : > { %813 = vmatmul.f32.gmra.mxu2 %v777_v13  ;;  %854 = vmatmul.f32.gmra.mxu3 %v777_v13 }
 0x193   : > { %v752_v14 = vpop.f32.mrf.mxu1 }
 0x194   : > { %v753_v15 = vadd.f32 %v752_v14, %v1642_v34 }
 0x196   : > { %vm762_vm0 = vcmp.ge.f32.partialorder %v753_v15, 0.0  ;;  %v770_v16 = vmul.f32 0.2, %v753_v15 }
 0x198   : > { %v778_v18 = vsel %vm762_vm0, %v753_v15, %v770_v16 }
 0x199   : > { %816 = vmatmul.f32.gmra.mxu2 %v778_v18  ;;  %857 = vmatmul.f32.gmra.mxu3 %v778_v18 }
 0x1a4   : > { %v508_v23 = vpop.f32.mrf.mxu2  ;;  %v549_v25 = vpop.f32.mrf.mxu3 }
 0x1a5   : > { %v509_v26 = vadd.f32 %v508_v23, %v1671_v21  ;;  %v550_v34 = vadd.f32 %v549_v25, %v1673_v22 }
 0x1a7   : > { %1142 = vtanh.f32 %v509_v26 }
 0x1a8   : > { %1144 = vtanh.f32 %v550_v34 }
 0x1ac   : > { %v511_v27 = vpop.f32.mrf.mxu2  ;;  %v552_v28 = vpop.f32.mrf.mxu3 }
 0x1ad   : > { %v1143_v29 = vpop.eup %1142  ;;  %v512_v30 = vadd.f32 %v511_v27, %v1671_v21  ;;  %v553_v31 = vadd.f32 %v552_v28, %v1673_v22 }
 0x1ae   : > { %v1145_v32 = vpop.eup %1144  ;;  %v589_v33 = vmul.f32 2.0, %v1143_v29 }
 0x1af   : > { %v590_v35 = vmul.f32 2.0, %v1145_v32  ;;  %1146 = vtanh.f32 %v512_v30 }
 0x1b0   : > { %605 = vst [vmem:[%s1682_s6] sm:$0xff] %v589_v33  ;;  %1148 = vtanh.f32 %v553_v31 }
 0x1b1   : > { %606 = vst [vmem:[%s1682_s6 + $0x8] sm:$0xff] %v590_v35 }
 0x1b4   : > { %v514_v36 = vpop.f32.mrf.mxu2  ;;  %v555_v37 = vpop.f32.mrf.mxu3 }
 0x1b5   : > { %v1147_v38 = vpop.eup %1146  ;;  %v515_v39 = vadd.f32 %v514_v36, %v1671_v21  ;;  %v556_v40 = vadd.f32 %v555_v37, %v1673_v22 }
 0x1b6   : > { %v1149_v41 = vpop.eup %1148  ;;  %v591_v42 = vmul.f32 2.0, %v1147_v38 }
 0x1b7   : > { %v592_v43 = vmul.f32 2.0, %v1149_v41  ;;  %1150 = vtanh.f32 %v515_v39 }
 0x1b8   : > { %607 = vst [vmem:[%s1682_s6 + $0x10] sm:$0xff] %v591_v42  ;;  %1152 = vtanh.f32 %v556_v40 }
 0x1b9   : > { %608 = vst [vmem:[%s1682_s6 + $0x18] sm:$0xff] %v592_v43 }
 0x1bc   : > { %v517_v44 = vpop.f32.mrf.mxu2  ;;  %v558_v45 = vpop.f32.mrf.mxu3 }
 0x1bd   : > { %v1151_v46 = vpop.eup %1150  ;;  %v518_v47 = vadd.f32 %v517_v44, %v1671_v21  ;;  %v559_v48 = vadd.f32 %v558_v45, %v1673_v22 }
 0x1be   : > { %v1153_v49 = vpop.eup %1152  ;;  %v593_v50 = vmul.f32 2.0, %v1151_v46 }
 0x1bf   : > { %v594_v51 = vmul.f32 2.0, %v1153_v49  ;;  %1154 = vtanh.f32 %v518_v47 }
 0x1c0   : > { %609 = vst [vmem:[%s1682_s6 + $0x20] sm:$0xff] %v593_v50  ;;  %1156 = vtanh.f32 %v559_v48 }
 0x1c1   : > { %610 = vst [vmem:[%s1682_s6 + $0x28] sm:$0xff] %v594_v51 }
 0x1c4   : > { %v520_v52 = vpop.f32.mrf.mxu2  ;;  %v561_v53 = vpop.f32.mrf.mxu3 }
 0x1c5   : > { %v1155_v54 = vpop.eup %1154  ;;  %v521_v55 = vadd.f32 %v520_v52, %v1671_v21  ;;  %v562_v56 = vadd.f32 %v561_v53, %v1673_v22 }
 0x1c6   : > { %v1157_v57 = vpop.eup %1156  ;;  %v595_v58 = vmul.f32 2.0, %v1155_v54 }
 0x1c7   : > { %v596_v59 = vmul.f32 2.0, %v1157_v57  ;;  %1158 = vtanh.f32 %v521_v55 }
 0x1c8   : > { %611 = vst [vmem:[%s1682_s6 + $0x30] sm:$0xff] %v595_v58  ;;  %1160 = vtanh.f32 %v562_v56 }
 0x1c9   : > { %612 = vst [vmem:[%s1682_s6 + $0x38] sm:$0xff] %v596_v59 }
 0x1cc   : > { %v523_v60 = vpop.f32.mrf.mxu2  ;;  %v564_v61 = vpop.f32.mrf.mxu3 }
 0x1cd   : > { %v1159_v62 = vpop.eup %1158  ;;  %v524_v63 = vadd.f32 %v523_v60, %v1671_v21  ;;  %v565_v0 = vadd.f32 %v564_v61, %v1673_v22 }
 0x1ce   : > { %v1161_v1 = vpop.eup %1160  ;;  %v597_v2 = vmul.f32 2.0, %v1159_v62 }
 0x1cf   : > { %v598_v3 = vmul.f32 2.0, %v1161_v1  ;;  %1162 = vtanh.f32 %v524_v63 }
 0x1d0   : > { %613 = vst [vmem:[%s1682_s6 + $0x40] sm:$0xff] %v597_v2  ;;  %1164 = vtanh.f32 %v565_v0 }
 0x1d1   : > { %614 = vst [vmem:[%s1682_s6 + $0x48] sm:$0xff] %v598_v3 }
 0x1d4   : > { %v526_v4 = vpop.f32.mrf.mxu2  ;;  %v567_v5 = vpop.f32.mrf.mxu3 }
 0x1d5   : > { %v1163_v6 = vpop.eup %1162  ;;  %v527_v8 = vadd.f32 %v526_v4, %v1671_v21  ;;  %v568_v11 = vadd.f32 %v567_v5, %v1673_v22 }
 0x1d6   : > { %v1165_v17 = vpop.eup %1164  ;;  %v599_v19 = vmul.f32 2.0, %v1163_v6 }
 0x1d7   : > { %v600_v24 = vmul.f32 2.0, %v1165_v17  ;;  %1166 = vtanh.f32 %v527_v8 }
 0x1d8   : > { %615 = vst [vmem:[%s1682_s6 + $0x50] sm:$0xff] %v599_v19  ;;  %1168 = vtanh.f32 %v568_v11 }
 0x1d9   : > { %616 = vst [vmem:[%s1682_s6 + $0x58] sm:$0xff] %v600_v24 }
 0x1dc   : > { %v529_v7 = vpop.f32.mrf.mxu2  ;;  %v570_v9 = vpop.f32.mrf.mxu3 }
 0x1dd   : > { %v1167_v10 = vpop.eup %1166  ;;  %v530_v12 = vadd.f32 %v529_v7, %v1671_v21  ;;  %v571_v13 = vadd.f32 %v570_v9, %v1673_v22 }
 0x1de   : > { %v1169_v14 = vpop.eup %1168  ;;  %v601_v15 = vmul.f32 2.0, %v1167_v10 }
 0x1df   : > { %v602_v16 = vmul.f32 2.0, %v1169_v14  ;;  %1170 = vtanh.f32 %v530_v12 }
 0x1e0   : > { %617 = vst [vmem:[%s1682_s6 + $0x60] sm:$0xff] %v601_v15  ;;  %1172 = vtanh.f32 %v571_v13 }
 0x1e1   : > { %618 = vst [vmem:[%s1682_s6 + $0x68] sm:$0xff] %v602_v16 }
 0x1e4   : > { %v796_v18 = vpop.f32.mrf.mxu2  ;;  %v837_v20 = vpop.f32.mrf.mxu3 }
 0x1e5   : > { %v1171_v23 = vpop.eup %1170  ;;  %v797_v25 = vadd.f32 %v796_v18, %v1671_v21  ;;  %v838_v26 = vadd.f32 %v837_v20, %v1673_v22 }
 0x1e6   : > { %v1173_v34 = vpop.eup %1172  ;;  %v603_v27 = vmul.f32 2.0, %v1171_v23 }
 0x1e7   : > { %v604_v28 = vmul.f32 2.0, %v1173_v34  ;;  %1174 = vtanh.f32 %v797_v25 }
 0x1e8   : > { %619 = vst [vmem:[%s1682_s6 + $0x70] sm:$0xff] %v603_v27  ;;  %1176 = vtanh.f32 %v838_v26 }
 0x1e9   : > { %620 = vst [vmem:[%s1682_s6 + $0x78] sm:$0xff] %v604_v28 }
 0x1ec   : > { %v799_v29 = vpop.f32.mrf.mxu2  ;;  %v840_v30 = vpop.f32.mrf.mxu3 }
 0x1ed   : > { %v1175_v31 = vpop.eup %1174  ;;  %v800_v32 = vadd.f32 %v799_v29, %v1671_v21  ;;  %v841_v33 = vadd.f32 %v840_v30, %v1673_v22 }
 0x1ee   : > { %v1177_v35 = vpop.eup %1176  ;;  %v877_v36 = vmul.f32 2.0, %v1175_v31 }
 0x1ef   : > { %v878_v37 = vmul.f32 2.0, %v1177_v35  ;;  %1178 = vtanh.f32 %v800_v32 }
 0x1f0   : > { %893 = vst [vmem:[%s1682_s6 + $0x80] sm:$0xff] %v877_v36  ;;  %1180 = vtanh.f32 %v841_v33 }
 0x1f1   : > { %894 = vst [vmem:[%s1682_s6 + $0x88] sm:$0xff] %v878_v37 }
 0x1f4   : > { %v802_v38 = vpop.f32.mrf.mxu2  ;;  %v843_v39 = vpop.f32.mrf.mxu3 }
 0x1f5   : > { %v1179_v40 = vpop.eup %1178  ;;  %v803_v41 = vadd.f32 %v802_v38, %v1671_v21  ;;  %v844_v42 = vadd.f32 %v843_v39, %v1673_v22 }
 0x1f6   : > { %v1181_v43 = vpop.eup %1180  ;;  %v879_v44 = vmul.f32 2.0, %v1179_v40 }
 0x1f7   : > { %v880_v45 = vmul.f32 2.0, %v1181_v43  ;;  %1182 = vtanh.f32 %v803_v41 }
 0x1f8   : > { %895 = vst [vmem:[%s1682_s6 + $0x90] sm:$0xff] %v879_v44  ;;  %1184 = vtanh.f32 %v844_v42 }
 0x1f9   : > { %896 = vst [vmem:[%s1682_s6 + $0x98] sm:$0xff] %v880_v45 }
 0x1fc   : > { %v805_v46 = vpop.f32.mrf.mxu2  ;;  %v846_v47 = vpop.f32.mrf.mxu3 }
 0x1fd   : > { %v1183_v48 = vpop.eup %1182  ;;  %v806_v49 = vadd.f32 %v805_v46, %v1671_v21  ;;  %v847_v50 = vadd.f32 %v846_v47, %v1673_v22 }
 0x1fe   : > { %v1185_v51 = vpop.eup %1184  ;;  %v881_v52 = vmul.f32 2.0, %v1183_v48 }
 0x1ff   : > { %v882_v53 = vmul.f32 2.0, %v1185_v51  ;;  %1186 = vtanh.f32 %v806_v49 }
 0x200   : > { %897 = vst [vmem:[%s1682_s6 + $0xa0] sm:$0xff] %v881_v52  ;;  %1188 = vtanh.f32 %v847_v50 }
 0x201   : > { %898 = vst [vmem:[%s1682_s6 + $0xa8] sm:$0xff] %v882_v53 }
 0x204   : > { %v808_v54 = vpop.f32.mrf.mxu2  ;;  %v849_v55 = vpop.f32.mrf.mxu3 }
 0x205   : > { %v1187_v56 = vpop.eup %1186  ;;  %v809_v57 = vadd.f32 %v808_v54, %v1671_v21  ;;  %v850_v58 = vadd.f32 %v849_v55, %v1673_v22 }
 0x206   : > { %v1189_v59 = vpop.eup %1188  ;;  %v883_v60 = vmul.f32 2.0, %v1187_v56 }
 0x207   : > { %v884_v61 = vmul.f32 2.0, %v1189_v59  ;;  %1190 = vtanh.f32 %v809_v57 }
 0x208   : > { %899 = vst [vmem:[%s1682_s6 + $0xb0] sm:$0xff] %v883_v60  ;;  %1192 = vtanh.f32 %v850_v58 }
 0x209   : > { %900 = vst [vmem:[%s1682_s6 + $0xb8] sm:$0xff] %v884_v61 }
 0x20c   : > { %v811_v62 = vpop.f32.mrf.mxu2  ;;  %v852_v63 = vpop.f32.mrf.mxu3 }
 0x20d   : > { %v1191_v0 = vpop.eup %1190  ;;  %v812_v1 = vadd.f32 %v811_v62, %v1671_v21  ;;  %v853_v2 = vadd.f32 %v852_v63, %v1673_v22 }
 0x20e   : > { %v1193_v3 = vpop.eup %1192  ;;  %v885_v4 = vmul.f32 2.0, %v1191_v0 }
 0x20f   : > { %v886_v5 = vmul.f32 2.0, %v1193_v3  ;;  %1194 = vtanh.f32 %v812_v1 }
 0x210   : > { %901 = vst [vmem:[%s1682_s6 + $0xc0] sm:$0xff] %v885_v4  ;;  %1196 = vtanh.f32 %v853_v2 }
 0x211   : > { %902 = vst [vmem:[%s1682_s6 + $0xc8] sm:$0xff] %v886_v5 }
 0x214   : > { %v814_v6 = vpop.f32.mrf.mxu2  ;;  %v855_v8 = vpop.f32.mrf.mxu3 }
 0x215   : > { %v1195_v11 = vpop.eup %1194  ;;  %v815_v17 = vadd.f32 %v814_v6, %v1671_v21  ;;  %v856_v19 = vadd.f32 %v855_v8, %v1673_v22 }
 0x216   : > { %v1197_v24 = vpop.eup %1196  ;;  %v887_v7 = vmul.f32 2.0, %v1195_v11 }
 0x217   : > { %v888_v9 = vmul.f32 2.0, %v1197_v24  ;;  %1198 = vtanh.f32 %v815_v17 }
 0x218   : > { %903 = vst [vmem:[%s1682_s6 + $0xd0] sm:$0xff] %v887_v7  ;;  %1200 = vtanh.f32 %v856_v19 }
 0x219   : > { %904 = vst [vmem:[%s1682_s6 + $0xd8] sm:$0xff] %v888_v9 }
 0x21c   : > { %v817_v10 = vpop.f32.mrf.mxu2  ;;  %v858_v12 = vpop.f32.mrf.mxu3 }
 0x21d   : > { %v1199_v13 = vpop.eup %1198  ;;  %v818_v14 = vadd.f32 %v817_v10, %v1671_v21  ;;  %v859_v15 = vadd.f32 %v858_v12, %v1673_v22 }
 0x21e   : > { %v1201_v16 = vpop.eup %1200  ;;  %v889_v18 = vmul.f32 2.0, %v1199_v13 }
 0x21f   : > { %v890_v20 = vmul.f32 2.0, %v1201_v16  ;;  %1202 = vtanh.f32 %v818_v14 }
 0x220   : > { %905 = vst [vmem:[%s1682_s6 + $0xe0] sm:$0xff] %v889_v18  ;;  %1204 = vtanh.f32 %v859_v15 }
 0x221   : > { %906 = vst [vmem:[%s1682_s6 + $0xe8] sm:$0xff] %v890_v20 }
 0x225   : > { %v1203_v21 = vpop.eup %1202 }
 0x226   : > { %v1205_v22 = vpop.eup %1204  ;;  %v891_v23 = vmul.f32 2.0, %v1203_v21 }
 0x227   : > { %v892_v25 = vmul.f32 2.0, %v1205_v22 }
 0x228   : > { %907 = vst [vmem:[%s1682_s6 + $0xf0] sm:$0xff] %v891_v23 }
 0x229   : > { %908 = vst [vmem:[%s1682_s6 + $0xf8] sm:$0xff] %v892_v25 }
 0x22a   : > { %1233 = shalt.err (!%p1230_p3)
}
 0x22b   : > { %s1270_s26 = smov 256   ;;  %s1271_s30 = smov 16  }
 0x22c   : > { %1101 = dma.vmem_to_hbm [thread:$0]  (%p1340_p5), %s924_s11, 4096, %s926_s12, %s910_s22, %s1270_s26, %s1270_s26, %s1271_s30  }
 0x22d PF: > { %p1107_p4 = scmp.ge.s32.totalorder %s1268_s21, 2  ;;  %s940_s6 = sand.u32 1, %s1256_s18  }
 0x22e   : > { %s941_s7 = scalar_lea.sflag [#allocation3], %s940_s6 }
 0x22f   : > { %p1104_p7 = pnand %p1107_p4, %p1344_p6 }
 0x231   : > { %p1105_p8 = pneg %p1104_p7 }
 0x233   : > { %1251 = dma.done.wait (%p1105_p8), %s941_s7, 4096  }
 0x234   : > { %1253 = vsyncadd (%p1105_p8), %s941_s7, 4294963200  ;;  %p15_p9 = scmp.ge.s32.totalorder %s1327_s24, 6   ;;  %s1786_s18 = smov %s1260_s19 }
 0x235   : > { %s1787_s19 = smov %s1264_s20  ;;  %s1788_s20 = smov %s1338_s27 }
 0x236   : > { %s1789_s21 = smov %s1327_s24  ;;  %17 = sbr.rel (!%p15_p9) target bundleno = 3 (0x3), region = 76 }
 0x23b   :  { %947 = vsyncpa [#allocation3], 1 }
 0x23c   :  { %949 = vsyncpa [#allocation3 + $0x1], 1 }

</bundles_post_ra>
